<compile_context>
chip_gen: v6e
topology: v6e:2x2x1
jax: 0.10.0
libtpu: 0.0.40
codegen_flags: <defaults>
</compile_context>

<pallas_src>
import functools

import jax
import jax.numpy as jnp
from jax import lax
from jax.experimental import pallas as pl
from jax.experimental.pallas import tpu as pltpu

R_PAD = 128  # LoRA rank padded to a full lane width (zero padding is mathematically identity)

# Contract the last dim of LHS with the last dim of RHS, no batch dims -> no XLU transpose.
_CONTRACT_LAST = (((1,), (1,)), ((), ()))


def _round_up(v, m):
    return ((v + m - 1) // m) * m


def _pad2(arr, rows, cols):
    r, c = arr.shape
    if (r, c) == (rows, cols):
        return arr
    return jnp.pad(arr, ((0, rows - r), (0, cols - c)))


def lora_kernel(x_ref, w_ref, a_ref, b_ref, bias_ref, o_ref, acc_main, acc_xa, *, scaling):
    kstep = pl.program_id(2)

    @pl.when(kstep == 0)
    def _():
        acc_main[...] = jnp.zeros_like(acc_main)
        acc_xa[...] = jnp.zeros_like(acc_xa)

    x = x_ref[...]  # (tm, tk)

    # Main linear path: x @ W.T accumulated in f32.
    acc_main[...] += lax.dot_general(
        x, w_ref[...], _CONTRACT_LAST, preferred_element_type=jnp.float32)
    # LoRA down-projection: x @ A.T accumulated in f32 (rank padded to 128 lanes).
    acc_xa[...] += lax.dot_general(
        x, a_ref[...], _CONTRACT_LAST, preferred_element_type=jnp.float32)

    @pl.when(kstep == pl.num_programs(2) - 1)
    def _():
        # Fold alpha/r into the small (tm, R_PAD) intermediate, not the (tm, tn) output.
        xa = (acc_xa[...] * scaling).astype(b_ref.dtype)
        lora = lax.dot_general(
            xa, b_ref[...], _CONTRACT_LAST, preferred_element_type=jnp.float32)  # (tm, tn)
        # f32 epilogue: bias add done once, only in the finalize branch.
        o_ref[...] = (acc_main[...] + lora + bias_ref[...]).astype(o_ref.dtype)


def lora_forward(x, W, bias, A, B, *, alpha, r,
                 tm=128, tn=256, tk=256,
                 compute_dtype=jnp.bfloat16):
    M, k = x.shape
    d, k2 = W.shape
    assert k2 == k and A.shape == (r, k) and B.shape == (d, r) and bias.shape == (d,)
    scaling = float(alpha) / float(r)
    out_dtype = x.dtype

    # Clamp tiles to the (padded) problem size while keeping (8, 128) alignment.
    tm = min(tm, _round_up(M, 8))
    tn = min(tn, _round_up(d, 128))
    tk = min(tk, _round_up(k, 128))
    Mp, dp, kp = _round_up(M, tm), _round_up(d, tn), _round_up(k, tk)

    # Zero-pad to tile multiples and cast streamed operands to the compute dtype.
    xp = _pad2(x, Mp, kp).astype(compute_dtype)
    Wp = _pad2(W, dp, kp).astype(compute_dtype)
    Ap = _pad2(A, R_PAD, kp).astype(compute_dtype)
    Bp = _pad2(B, dp, R_PAD).astype(compute_dtype)
    bp = _pad2(bias.reshape(1, d), 1, dp).astype(jnp.float32)  # epilogue stays f32

    grid = (Mp // tm, dp // tn, kp // tk)

    itemsize = jnp.dtype(compute_dtype).itemsize
    flops = 2 * Mp * dp * kp + 2 * Mp * R_PAD * kp + 2 * Mp * R_PAD * dp
    bytes_accessed = (Mp * kp * itemsize * grid[1]        # x streamed once per output-col tile
                      + dp * kp * itemsize * grid[0]      # W streamed once per output-row tile
                      + R_PAD * kp * itemsize * grid[0]   # A
                      + dp * R_PAD * itemsize * grid[0]   # B
                      + dp * 4                            # bias
                      + Mp * dp * jnp.dtype(out_dtype).itemsize)

    kernel = functools.partial(lora_kernel, scaling=scaling)
    out = pl.pallas_call(
        kernel,
        out_shape=jax.ShapeDtypeStruct((Mp, dp), out_dtype),
        grid_spec=pltpu.PrefetchScalarGridSpec(
            num_scalar_prefetch=0,
            grid=grid,
            in_specs=[
                pl.BlockSpec((tm, tk), lambda i, j, kk: (i, kk)),      # x
                pl.BlockSpec((tn, tk), lambda i, j, kk: (j, kk)),      # W
                pl.BlockSpec((R_PAD, tk), lambda i, j, kk: (0, kk)),   # A (rank-padded)
                pl.BlockSpec((tn, R_PAD), lambda i, j, kk: (j, 0)),    # B (rank-padded)
                pl.BlockSpec((1, tn), lambda i, j, kk: (0, j)),        # bias
            ],
            out_specs=pl.BlockSpec((tm, tn), lambda i, j, kk: (i, j)),
            scratch_shapes=[
                pltpu.VMEM((tm, tn), jnp.float32),     # main accumulator
                pltpu.VMEM((tm, R_PAD), jnp.float32),  # x @ A.T accumulator
            ],
        ),
        compiler_params=pltpu.CompilerParams(
            dimension_semantics=("parallel", "parallel", "arbitrary"),
            vmem_limit_bytes=32 * 1024 * 1024,
        ),
        cost_estimate=pl.CostEstimate(
            flops=flops, transcendentals=0, bytes_accessed=bytes_accessed),
    )(xp, Wp, Ap, Bp, bp)

    return out[:M, :d]


if __name__ == "__main__":
    # Small shapes consistent with the module: batch=16, in/out features 512, rank r=8.
    M, k, d, r, alpha = 16, 512, 512, 8, 16

    key = jax.random.PRNGKey(0)
    kx, kw, kb, kA, kB = jax.random.split(key, 5)

    x = jax.random.normal(kx, (M, k), dtype=jnp.float32)
    W = jax.random.normal(kw, (d, k), dtype=jnp.float32) * 0.05   # original Linear weight
    bias = jax.random.normal(kb, (d,), dtype=jnp.float32) * 0.1   # original Linear bias
    # Nonzero A so the LoRA path + scaling are exercised numerically
    # (the module's zeros-init A would make the adapter contribute exactly 0).
    A = jax.random.normal(kA, (r, k), dtype=jnp.float32) * 0.02
    B = jax.random.normal(kB, (d, r), dtype=jnp.float32)

    hp = jax.lax.Precision.HIGHEST
    ref = (jnp.dot(x, W.T, precision=hp) + bias
           + jnp.dot(jnp.dot(x, A.T, precision=hp), B.T, precision=hp) * (alpha / r))

    # f32-compute path.
    out_f32 = jax.block_until_ready(
        lora_forward(x, W, bias, A, B, alpha=alpha, r=r, compute_dtype=jnp.float32))
    assert out_f32.shape == (M, d)
    assert jnp.allclose(out_f32, ref, atol=2e-2, rtol=2e-2), \
        float(jnp.max(jnp.abs(out_f32 - ref)))

    # bf16-input / f32-accumulate path (the production config).
    out_bf16 = jax.block_until_ready(
        lora_forward(x, W, bias, A, B, alpha=alpha, r=r, compute_dtype=jnp.bfloat16))
    assert jnp.allclose(out_bf16, ref, atol=8e-2, rtol=8e-2), \
        float(jnp.max(jnp.abs(out_bf16 - ref)))

    # Zeros-init A (the module's default init) must collapse to the plain Linear output.
    out_zero = jax.block_until_ready(
        lora_forward(x, W, bias, jnp.zeros_like(A), B, alpha=alpha, r=r,
                     compute_dtype=jnp.float32))
    ref_zero = jnp.dot(x, W.T, precision=hp) + bias
    assert jnp.allclose(out_zero, ref_zero, atol=2e-2, rtol=2e-2)

    print("KERNEL_OK")
</pallas_src>

<mosaic_0001>
module attributes {stable_mosaic.version = 11 : i64} {
  func.func @lora_kernel(%arg0: i32, %arg1: i32, %arg2: i32, %arg3: memref<16x256xf32, #tpu.memory_space<vmem>>, %arg4: memref<256x256xf32, #tpu.memory_space<vmem>>, %arg5: memref<128x256xf32, #tpu.memory_space<vmem>>, %arg6: memref<256x128xf32, #tpu.memory_space<vmem>>, %arg7: memref<1x256xf32, #tpu.memory_space<vmem>>, %arg8: memref<16x256xf32, #tpu.memory_space<vmem>>, %arg9: memref<16x256xf32, #tpu.memory_space<vmem>>, %arg10: memref<16x128xf32, #tpu.memory_space<vmem>>) attributes {dimension_semantics = [#tpu.dimension_semantics<parallel>, #tpu.dimension_semantics<parallel>, #tpu.dimension_semantics<arbitrary>], iteration_bounds = array<i64: 1, 2, 2>, scalar_prefetch = 0 : i64, scratch_operands = 2 : i64, tpu.core_type = #tpu.core_type<tc>, window_params = [{transform_indices = @transform_0, window_bounds = array<i64: 16, 256>}, {transform_indices = @transform_1, window_bounds = array<i64: 256, 256>}, {transform_indices = @transform_2, window_bounds = array<i64: 128, 256>}, {transform_indices = @transform_3, window_bounds = array<i64: 256, 128>}, {transform_indices = @transform_4, window_bounds = array<i64: 1, 256>}, {transform_indices = @transform_5, window_bounds = array<i64: 16, 256>}]} {
    %c0_i32 = arith.constant 0 : i32
    %0 = arith.cmpi eq, %arg2, %c0_i32 : i32
    %1 = arith.extui %0 : i1 to i32
    %c0_i32_0 = arith.constant 0 : i32
    %2 = arith.cmpi ne, %1, %c0_i32_0 : i32
    scf.if %2 {
      %cst_16 = arith.constant 0.000000e+00 : f32
      %17 = vector.broadcast %cst_16 : f32 to vector<16x256xf32>
      %c0_17 = arith.constant 0 : index
      %c0_18 = arith.constant 0 : index
      %18 = vector.load %arg9[%c0_17, %c0_18] : memref<16x256xf32, #tpu.memory_space<vmem>>, vector<16x256xf32>
      tpu.vector_store %arg9[%c0_17, %c0_18], %17 {strides = array<i32>} : memref<16x256xf32, #tpu.memory_space<vmem>>, vector<16x256xf32>,
      %cst_19 = arith.constant 0.000000e+00 : f32
      %19 = vector.broadcast %cst_19 : f32 to vector<16x128xf32>
      %c0_20 = arith.constant 0 : index
      %c0_21 = arith.constant 0 : index
      %20 = vector.load %arg10[%c0_20, %c0_21] : memref<16x128xf32, #tpu.memory_space<vmem>>, vector<16x128xf32>
      tpu.vector_store %arg10[%c0_20, %c0_21], %19 {strides = array<i32>} : memref<16x128xf32, #tpu.memory_space<vmem>>, vector<16x128xf32>,
    } else {
    }
    %c0 = arith.constant 0 : index
    %c0_1 = arith.constant 0 : index
    %3 = vector.load %arg3[%c0, %c0_1] : memref<16x256xf32, #tpu.memory_space<vmem>>, vector<16x256xf32>
    %c0_2 = arith.constant 0 : index
    %c0_3 = arith.constant 0 : index
    %4 = vector.load %arg9[%c0_2, %c0_3] : memref<16x256xf32, #tpu.memory_space<vmem>>, vector<16x256xf32>
    %c0_4 = arith.constant 0 : index
    %c0_5 = arith.constant 0 : index
    %5 = vector.load %arg4[%c0_4, %c0_5] : memref<256x256xf32, #tpu.memory_space<vmem>>, vector<256x256xf32>
    %cst = arith.constant dense<0.000000e+00> : vector<16x256xf32>
    %6 = tpu.matmul %3, %5, %cst {dimension_numbers = #tpu.dot_dimension_numbers<[1], [1], [0], [0], [0, 0, 1, 0], [], []>} : vector<16x256xf32>, vector<256x256xf32>, vector<16x256xf32> -> vector<16x256xf32>
    %7 = arith.addf %4, %6 : vector<16x256xf32>
    %c0_6 = arith.constant 0 : index
    %c0_7 = arith.constant 0 : index
    %8 = vector.load %arg9[%c0_6, %c0_7] : memref<16x256xf32, #tpu.memory_space<vmem>>, vector<16x256xf32>
    tpu.vector_store %arg9[%c0_6, %c0_7], %7 {strides = array<i32>} : memref<16x256xf32, #tpu.memory_space<vmem>>, vector<16x256xf32>,
    %c0_8 = arith.constant 0 : index
    %c0_9 = arith.constant 0 : index
    %9 = vector.load %arg10[%c0_8, %c0_9] : memref<16x128xf32, #tpu.memory_space<vmem>>, vector<16x128xf32>
    %c0_10 = arith.constant 0 : index
    %c0_11 = arith.constant 0 : index
    %10 = vector.load %arg5[%c0_10, %c0_11] : memref<128x256xf32, #tpu.memory_space<vmem>>, vector<128x256xf32>
    %cst_12 = arith.constant dense<0.000000e+00> : vector<16x128xf32>
    %11 = tpu.matmul %3, %10, %cst_12 {dimension_numbers = #tpu.dot_dimension_numbers<[1], [1], [0], [0], [0, 0, 1, 0], [], []>} : vector<16x256xf32>, vector<128x256xf32>, vector<16x128xf32> -> vector<16x128xf32>
    %12 = arith.addf %9, %11 : vector<16x128xf32>
    %c0_13 = arith.constant 0 : index
    %c0_14 = arith.constant 0 : index
    %13 = vector.load %arg10[%c0_13, %c0_14] : memref<16x128xf32, #tpu.memory_space<vmem>>, vector<16x128xf32>
    tpu.vector_store %arg10[%c0_13, %c0_14], %12 {strides = array<i32>} : memref<16x128xf32, #tpu.memory_space<vmem>>, vector<16x128xf32>,
    %c1_i32 = arith.constant 1 : i32
    %14 = arith.cmpi eq, %arg2, %c1_i32 : i32
    %15 = arith.extui %14 : i1 to i32
    %c0_i32_15 = arith.constant 0 : i32
    %16 = arith.cmpi ne, %15, %c0_i32_15 : i32
    scf.if %16 {
      %c0_16 = arith.constant 0 : index
      %c0_17 = arith.constant 0 : index
      %17 = vector.load %arg10[%c0_16, %c0_17] : memref<16x128xf32, #tpu.memory_space<vmem>>, vector<16x128xf32>
      %cst_18 = arith.constant 2.000000e+00 : f32
      %18 = vector.broadcast %cst_18 : f32 to vector<16x128xf32>
      %19 = arith.mulf %17, %18 : vector<16x128xf32>
      %c0_19 = arith.constant 0 : index
      %c0_20 = arith.constant 0 : index
      %20 = vector.load %arg6[%c0_19, %c0_20] : memref<256x128xf32, #tpu.memory_space<vmem>>, vector<256x128xf32>
      %cst_21 = arith.constant dense<0.000000e+00> : vector<16x256xf32>
      %21 = tpu.matmul %19, %20, %cst_21 {dimension_numbers = #tpu.dot_dimension_numbers<[1], [1], [0], [0], [0, 0, 1, 0], [], []>} : vector<16x128xf32>, vector<256x128xf32>, vector<16x256xf32> -> vector<16x256xf32>
      %c0_22 = arith.constant 0 : index
      %c0_23 = arith.constant 0 : index
      %22 = vector.load %arg9[%c0_22, %c0_23] : memref<16x256xf32, #tpu.memory_space<vmem>>, vector<16x256xf32>
      %23 = arith.addf %22, %21 : vector<16x256xf32>
      %c0_24 = arith.constant 0 : index
      %c0_25 = arith.constant 0 : index
      %24 = vector.load %arg7[%c0_24, %c0_25] : memref<1x256xf32, #tpu.memory_space<vmem>>, vector<1x256xf32>
      %25 = vector.broadcast %24 : vector<1x256xf32> to vector<16x256xf32>
      %26 = arith.addf %23, %25 : vector<16x256xf32>
      %c0_26 = arith.constant 0 : index
      %c0_27 = arith.constant 0 : index
      %27 = vector.load %arg8[%c0_26, %c0_27] : memref<16x256xf32, #tpu.memory_space<vmem>>, vector<16x256xf32>
      tpu.vector_store %arg8[%c0_26, %c0_27], %26 {strides = array<i32>} : memref<16x256xf32, #tpu.memory_space<vmem>>, vector<16x256xf32>,
    } else {
    }
    return
  }
  func.func @transform_0(%arg0: i32, %arg1: i32, %arg2: i32) -> (i32, i32) {
    %c0_i32 = arith.constant 0 : i32
    return %arg0, %arg2 : i32, i32
  }
  func.func @transform_1(%arg0: i32, %arg1: i32, %arg2: i32) -> (i32, i32) {
    %c0_i32 = arith.constant 0 : i32
    return %arg1, %arg2 : i32, i32
  }
  func.func @transform_2(%arg0: i32, %arg1: i32, %arg2: i32) -> (i32, i32) {
    %c0_i32 = arith.constant 0 : i32
    %c0_i32_0 = arith.constant 0 : i32
    return %c0_i32, %arg2 : i32, i32
  }
  func.func @transform_3(%arg0: i32, %arg1: i32, %arg2: i32) -> (i32, i32) {
    %c0_i32 = arith.constant 0 : i32
    %c0_i32_0 = arith.constant 0 : i32
    return %arg1, %c0_i32 : i32, i32
  }
  func.func @transform_4(%arg0: i32, %arg1: i32, %arg2: i32) -> (i32, i32) {
    %c0_i32 = arith.constant 0 : i32
    %c0_i32_0 = arith.constant 0 : i32
    return %c0_i32, %arg1 : i32, i32
  }
  func.func @transform_5(%arg0: i32, %arg1: i32, %arg2: i32) -> (i32, i32) {
    %c0_i32 = arith.constant 0 : i32
    return %arg0, %arg1 : i32, i32
  }
}

</mosaic_0001>

<bundles_post_ra>
// kernel: tpu_custom_call.1
= control target key start
LH: loop header
LB: loop body
LE: loop exit
PB: predicated region body
PF: predicated region fallthrough
CT: control target
= control target key end

     0   :  { %s2129_s0 = inlined_call_operand.hbm [shape: f32[16,512], index: 0, kind: input, shape index: {}]   ;;  %s2130_s1 = inlined_call_operand.hbm [shape: f32[512,512], index: 1, kind: input, shape index: {}]   ;;  %s2131_s2 = inlined_call_operand.hbm [shape: f32[128,512], index: 2, kind: input, shape index: {}]   ;;  %s2132_s3 = inlined_call_operand.hbm [shape: f32[512,128], index: 3, kind: input, shape index: {}]   ;;  %s2133_s4 = inlined_call_operand.vmem [shape: f32[1,512], index: 4, kind: input, shape index: {}]   ;;  %s2134_s5 = inlined_call_operand.hbm [shape: f32[16,512], index: 5, kind: output, shape index: {}]  }
   0x1   :  { %2148 = sst [smem:[#allocation25_spill]] %s2129_s0 }
   0x2   :  { %2149 = sst [smem:[#allocation26_spill]] %s2130_s1 }
   0x3   :  { %2150 = sst [smem:[#allocation27_spill]] %s2131_s2 }
   0x4   :  { %2151 = sst [smem:[#allocation28_spill]] %s2132_s3 }
   0x5   :  { %2152 = sst [smem:[#allocation29_spill]] %s2133_s4 }
   0x6   :  { %2153 = sst [smem:[#allocation30_spill]] %s2134_s5 }
   0x7   :  { %10 = vsyncpa [#allocation5], 0 }
   0x8   :  { %12 = vsyncpa [#allocation5 + $0x1], 0 }
   0x9   :  { %13 = vsyncpa [#allocation8], 0 }
   0xa   :  { %15 = vsyncpa [#allocation8 + $0x1], 0 }
   0xb   :  { %16 = vsyncpa [#allocation11], 0 }
   0xc   :  { %18 = vsyncpa [#allocation11 + $0x1], 0 }
   0xd   :  { %19 = vsyncpa [#allocation6], 0 }
   0xe   :  { %21 = vsyncpa [#allocation6 + $0x1], 0  ;;  %s1600_s18 = smov 0   ;;  %s1602_s19 = smov 0  }
   0xf   :  { %s1604_s20 = smov 0   ;;  %s1606_s21 = smov 0  }
  0x10   :  { %s1608_s22 = smov 0   ;;  %s1610_s23 = smov 0  }
  0x11   :  { %s1612_s24 = smov 0   ;;  %s1614_s25 = smov 0  }
  0x12   :  { %s1616_s26 = smov 0   ;;  %s1618_s27 = smov 0  }
  0x13   :  { %s1620_s28 = smov 0   ;;  %s1622_s29 = smov 0  }
  0x14   :  { %s1624_s30 = smov 0   ;;  %s1626_s6 = smov 0  }
  0x15 LB: > { %2154 = sst [smem:[#allocation18_spill]] %s1502_s18  ;;  %s39_s7 = sadd.s32 1, %s1546_s29  ;;  %s1554_s6 = sphi %s1626_s6, %s27_s6   ;;  %s1550_s30 = sphi %s1624_s30, %s2209_s30   ;;  %s1546_s29 = sphi %s1622_s29, %s2208_s29   ;;  %s1542_s28 = sphi %s1620_s28, %s2195_s28   ;;  %s1538_s27 = sphi %s1618_s27, %s2207_s27   ;;  %s1534_s26 = sphi %s1616_s26, %s2206_s26   ;;  %s1530_s25 = sphi %s1614_s25, %s2205_s25   ;;  %s1526_s24 = sphi %s1612_s24, %s2204_s24   ;;  %s1522_s23 = sphi %s1610_s23, %s2203_s23   ;;  %s1518_s22 = sphi %s1608_s22, %s2202_s22   ;;  %s1514_s21 = sphi %s1606_s21, %s2201_s21   ;;  %s1510_s20 = sphi %s1604_s20, %s2200_s20   ;;  %s1506_s19 = sphi %s1602_s19, %s2199_s19   ;;  %s1502_s18 = sphi %s1600_s18, %s2194_s18  }
  0x16   : > { %2155 = sst [smem:[#allocation19_spill]] %s1506_s19  ;;  %s42_s8 = sadd.s32 1, %s1550_s30 }
  0x17   : > { %2156 = sst [smem:[#allocation20_spill]] %s1538_s27  ;;  %p40_p0 = scmp.ge.s32.totalorder %s39_s7, 2 }
  0x18   : > { %2157 = sst [smem:[#allocation21_spill]] %s1542_s28  ;;  %p63_p1 = scmp.eq.s32.totalorder %s1554_s6, 0 }
  0x19   : > { %2158 = sst [smem:[#allocation22_spill]] %s1550_s30  ;;  %s83_s9 = sadd.s32 1, %s1522_s23 }
  0x1a   : > { %p90_p2 = scmp.ne.s32.totalorder %s1522_s23, %s1518_s22  ;;  %s2211_s7 = smov (%p40_p0, %s39_s7), 0 }
  0x1b   : > { %2159 = sst [smem:[#allocation23_spill]] %s2211_s7  ;;  %s2213_s8 = smov (!%p40_p0, %s42_s8), %s1550_s30 }
  0x1c   : > { %s1681_s10 = ssub.s32 %s1546_s29, %s2211_s7  ;;  %p1685_p3 = por %p90_p2, %p63_p1 }
  0x1d   : > { %p44_p4 = scmp.ge.s32.totalorder %s2213_s8, 2  ;;  %p53_p5 = scmp.eq.s32.totalorder %s1681_s10, 0 }
  0x1e   : > { %p2145_p7 = scmp.lt.s32.totalorder %s1554_s6, 4  ;;  %s250_s14 = sand.u32 1, %s1554_s6  }
  0x1f   : > { %s2215_s8 = smov (%p44_p4, %s2213_s8), 0  ;;  %s252_s15 = sand.u32 1, %s1522_s23  }
  0x20   : > { %2161 = sst [smem:[#allocation24_spill]] %s2215_s8  ;;  %s1697_s12 = ssub.s32 %s1550_s30, %s2215_s8 }
  0x21   : > { %s80_s13 = sor.u32 %s1697_s12, %s1681_s10  ;;  %s1038_s17 = sshll.u32 %s252_s15, 9 }
  0x22   : > { %p81_p8 = scmp.eq.s32.totalorder %s80_s13, 0  ;;  %s1040_s7 = sshll.u32 %s1546_s29, 1 }
  0x23   : > { %s1064_s5 = sshll.u32 %s1550_s30, 7  ;;  %s254_s4 = scalar_lea.vmem [#allocation7], %s1038_s17 }
  0x24   : > { %s1704_s16 = scalar_select %p81_p8, %s1522_s23, %s83_s9  }
  0x25   : > { %s261_s27 = sadd.s32 %s1064_s5, %s1040_s7  ;;  %s264_s28 = sshll.u32 %s254_s4, 4  ;;  %s265_s28 = int_to_ptr.vmem [resolvable:$true] %s264_s28 }
  0x26   : > { %s1042_s3 = sshll.u32 %s261_s27, 7  ;;  %s2162_s1 = sld [smem:[#allocation26_spill]] }
  0x27   : > { %p1715_p9 = pnand %p2145_p7, %p1685_p3  ;;  %p1049_p10 = scmp.ge.s32.totalorder %s1554_s6, 1 }
  0x28   : > { %p322_p11 = scmp.lt.s32.totalorder %s1554_s6, 5  ;;  %s1721_s9 = scalar_lea.sflag [#allocation8], %s250_s14 }
  0x29   : > { %p1288_p12 = pneg %p1715_p9  ;;  %s1299_s4 = scalar_lea.vmem %s265_s28, 8192 }
  0x2a   : > { %p1300_p13 = scmp.ne.s32.totalorder %s265_s28, %s1299_s4  ;;  %s1556_s5 = smov [#allocation7]  }
  0x2b   : > { %s1304_s18 = sshll.u32 %s1556_s5, 4  ;;  %s1305_s18 = int_to_ptr.vmem [resolvable:$false] %s1304_s18 }
  0x2c   : > { %s263_s19 = scalar_lea.hbm %s2162_s1, %s1042_s3  ;;  %p1302_p0 = pnand %p1300_p13, %p1288_p12 }
  0x2d   : > { %s1306_s3 = scalar_lea.vmem %s1305_s18, 16384  ;;  %p1307_p4 = scmp.lt.s32.totalorder %s265_s28, %s1305_s18 }
  0x2e   : > { %p1303_p2 = pneg %p1302_p0  ;;  %p1308_p3 = scmp.lt.s32.totalorder %s1306_s3, %s1299_s4 }
  0x30   : > { %p1309_p8 = por %p1308_p3, %p1307_p4 }
  0x32   : > { %p1310_p6 = pnand %p1309_p8, %p1303_p2 }
  0x34   : > { %1313 = shalt.err (!%p1310_p6)
}
  0x35   : > { %s2139_s27 = smov 512   ;;  %s2141_s7 = smov 256  }
  0x36   : > { %s2143_s8 = smov 16   ;;  %p1735_p6 = pnand %p1049_p10, %p322_p11 }
  0x37   : > { %1152 = dma.hbm_to_vmem [thread:$0]  (!%p1715_p9), %s263_s19, 8192, %s265_s28, %s1721_s9, %s2139_s27, %s2141_s7, %s2143_s8  }
  0x38   : > { %s55_s14 = sadd.s32 1, %s1534_s26  ;;  %p62_p12 = scmp.ne.s32.totalorder %s1534_s26, %s1530_s25 }
  0x39   : > { %s1745_s15 = scalar_select %p53_p5, %s1534_s26, %s55_s14  }
  0x3a   : > { %p64_p13 = por %p63_p1, %p62_p12  ;;  %p68_p0 = scmp.ne.s32.totalorder %s1530_s25, %s1526_s24 }
  0x3b   : > { %s1752_s17 = sand.u32 1, %s1534_s26   ;;  %s1063_s19 = sshll.u32 %s1546_s29, 8 }
  0x3c   : > { %s1035_s28 = sshll.u32 %s1752_s17, 5  ;;  %s2165_s0 = sld [smem:[#allocation25_spill]] }
  0x3d   : > { %s230_s18 = scalar_lea.vmem [#allocation4], %s1035_s28  ;;  %p1761_p9 = pnand %p2145_p7, %p64_p13 }
  0x3e   : > { %s240_s3 = sshll.u32 %s230_s18, 4  ;;  %s2167_s2 = sld [smem:[#allocation27_spill]]  ;;  %s241_s3 = int_to_ptr.vmem [resolvable:$true] %s240_s3 }
  0x3f   : > { %s1043_s8 = sshll.u32 %s1752_s17, 8  ;;  %s227_s1 = scalar_lea.sflag [#allocation5], %s1752_s17 }
  0x40   : > { %p1316_p5 = pneg %p1761_p9  ;;  %s1327_s13 = scalar_lea.vmem %s241_s3, 512 }
  0x41   : > { %p1328_p10 = scmp.ne.s32.totalorder %s241_s3, %s1327_s13  ;;  %s1560_s28 = smov [#allocation4]  }
  0x42   : > { %s239_s5 = scalar_lea.hbm %s2165_s0, %s1063_s19  ;;  %s1332_s4 = sshll.u32 %s1560_s28, 4  ;;  %s1333_s4 = int_to_ptr.vmem [resolvable:$false] %s1332_s4 }
  0x43   : > { %p1330_p11 = pnand %p1328_p10, %p1316_p5  ;;  %s1334_s18 = scalar_lea.vmem %s1333_s4, 1024 }
  0x44   : > { %s1768_s7 = scalar_lea.hbm %s2167_s2, %s1063_s19  ;;  %p1335_p4 = scmp.lt.s32.totalorder %s241_s3, %s1333_s4 }
  0x45   : > { %p1331_p2 = pneg %p1330_p11  ;;  %p1336_p3 = scmp.lt.s32.totalorder %s1334_s18, %s1327_s13 }
  0x47   : > { %p1337_p8 = por %p1336_p3, %p1335_p4 }
  0x49   : > { %p1338_p12 = pnand %p1337_p8, %p1331_p2 }
  0x4b   : > { %1341 = shalt.err (!%p1338_p12)
}
  0x4c   : > { %s2168_s27 = smov 16   ;;  %s2169_s17 = smov 256  }
  0x4d   : > { %s2170_s19 = smov 512   ;;  %s278_s14 = scalar_lea.vmem [#allocation9], %s1043_s8 }
  0x4e   : > { %1149 = dma.hbm_to_vmem [thread:$0]  (!%p1761_p9), %s239_s5, 512, %s241_s3, %s227_s1, %s2170_s19, %s2169_s17, %s2168_s27  }
  0x4f   : > { %s285_s0 = sshll.u32 %s278_s14, 4  ;;  %s1561_s13 = smov [#allocation9]   ;;  %s286_s0 = int_to_ptr.vmem [resolvable:$true] %s285_s0 }
  0x50   : > { %s1355_s2 = scalar_lea.vmem %s286_s0, 4096  ;;  %s1360_s28 = sshll.u32 %s1561_s13, 4  ;;  %s1361_s28 = int_to_ptr.vmem [resolvable:$false] %s1360_s28 }
  0x51   : > { %p1356_p13 = scmp.ne.s32.totalorder %s286_s0, %s1355_s2  ;;  %s1362_s4 = scalar_lea.vmem %s1361_s28, 8192 }
  0x52   : > { %p1363_p2 = scmp.lt.s32.totalorder %s286_s0, %s1361_s28  ;;  %p1364_p4 = scmp.lt.s32.totalorder %s1362_s4, %s1355_s2 }
  0x53   : > { %p1358_p10 = pnand %p1356_p13, %p1316_p5 }
  0x54   : > { %p1365_p3 = por %p1364_p4, %p1363_p2 }
  0x55   : > { %p1359_p11 = pneg %p1358_p10 }
  0x57   : > { %p1366_p8 = pnand %p1365_p3, %p1359_p11 }
  0x59   : > { %1369 = shalt.err (!%p1366_p8)
}
  0x5a   : > { %s2171_s1 = sld [smem:[#allocation19_spill]]  ;;  %s1793_s8 = sadd.s32 4294967295, %s1554_s6  }
  0x5b   : > { %s2172_s2 = sld [smem:[#allocation18_spill]]  ;;  %s1032_s5 = sadd.s32 4294967294, %s1554_s6  }
  0x5c   : > { %1155 = dma.hbm_to_vmem [thread:$0]  (!%p1761_p9), %s1768_s7, 4096, %s286_s0, %s1721_s9, %s2170_s19, %s2169_s17, %s2168_s27  }
  0x5d   : > { %p69_p5 = scmp.eq.s32.totalorder %s1793_s8, 0  ;;  %p133_p12 = scmp.eq.s32.totalorder %s1697_s12, 0 }
  0x5e   : > { %s135_s3 = sadd.s32 1, %s1510_s20  ;;  %p2174_p10 = scmp.ne.s32.totalorder %s1518_s22, %s1514_s21 }
  0x5f   : > { %p1802_p13 = por %p69_p5, %p68_p0  ;;  %p200_p4 = scmp.eq.s32.totalorder %s1793_s8, 3 }
  0x60   : > { %p1809_p11 = por %p2174_p10, %p69_p5  ;;  %p142_p9 = scmp.ne.s32.totalorder %s1510_s20, %s2171_s1 }
  0x61   : > { %s1814_s0 = scalar_select %p133_p12, %s1510_s20, %s135_s3  }
  0x62   : > { %p148_p2 = scmp.ne.s32.totalorder %s2171_s1, %s2172_s2  ;;  %p206_p3 = scmp.eq.s32.totalorder %s1032_s5, 3 }
  0x63   : > { %p144_p8 = por %p142_p9, %p63_p1  ;;  %p1827_p0 = por %p200_p4, %p142_p9 }
  0x64   : > { %p1823_p7 = por %p148_p2, %p69_p5  ;;  %p1831_p10 = por %p206_p3, %p148_p2 }
  0x65   : > { %s2177_s12 = scalar_select %p1827_p0, 1, 0 }
  0x66   : > { %s2178_s21 = scalar_select %p1831_p10, 1, 0 }
  0x67   : > { %s295_s9 = sand.u32 1, %s1510_s20   ;;  %s1066_s7 = sshll.u32 %s1550_s30, 12 }
  0x68   : > { %s1046_s27 = sshll.u32 %s295_s9, 8  ;;  %s2179_s14 = sld [smem:[#allocation28_spill]] }
  0x69   : > { %s299_s28 = scalar_lea.vmem [#allocation10], %s1046_s27  ;;  %p2180_p1 = scmp.lt.s32.totalorder %s1554_s6, 4 }
  0x6a   : > { %s306_s4 = sshll.u32 %s299_s28, 4  ;;  %s296_s2 = scalar_lea.sflag [#allocation11], %s295_s9  ;;  %s307_s4 = int_to_ptr.vmem [resolvable:$true] %s306_s4 }
  0x6b   : > { %p1842_p5 = pnand %p2180_p1, %p144_p8  ;;  %s1383_s5 = scalar_lea.vmem %s307_s4, 4096 }
  0x6c   : > { %p1384_p9 = scmp.ne.s32.totalorder %s307_s4, %s1383_s5  ;;  %s1562_s3 = smov [#allocation10]  }
  0x6d   : > { %p1372_p12 = pneg %p1842_p5  ;;  %s1388_s30 = sshll.u32 %s1562_s3, 4  ;;  %s1389_s30 = int_to_ptr.vmem [resolvable:$false] %s1388_s30 }
  0x6e   : > { %s305_s13 = scalar_lea.hbm %s2179_s14, %s1066_s7  ;;  %s1390_s7 = scalar_lea.vmem %s1389_s30, 8192 }
  0x6f   : > { %p1386_p2 = pnand %p1384_p9, %p1372_p12  ;;  %p1391_p3 = scmp.lt.s32.totalorder %s307_s4, %s1389_s30 }
  0x70   : > { %p1392_p10 = scmp.lt.s32.totalorder %s1390_s7, %s1383_s5 }
  0x71   : > { %p1387_p4 = pneg %p1386_p2 }
  0x72   : > { %p1393_p0 = por %p1392_p10, %p1391_p3 }
  0x74   : > { %p1394_p8 = pnand %p1393_p0, %p1387_p4 }
  0x76   : > { %1397 = shalt.err (!%p1394_p8)
}
  0x77   : > { %s1563_s27 = smov 128   ;;  %s1564_s17 = smov 8  }
  0x78   : > { %1158 = dma.hbm_to_vmem [thread:$0]  (!%p1842_p5), %s305_s13, 4096, %s307_s4, %s296_s2, %s1563_s27, %s1563_s27, %s1564_s17  }
  0x79   : > { %326 = sbr.rel (%p1735_p6) target bundleno = 787 (0x313), region = 40  ;;  %s328_s9 = sand.u32 (!%p1735_p6), 1, %s1530_s25  }
  0x7a   : > { %s1050_s19 = sshll.u32 (!%p1735_p6), %s328_s9, 5  ;;  %s329_s14 = scalar_lea.sflag (!%p1735_p6), [#allocation5], %s328_s9 }
  0x7b   : > { %s1853_s28 = scalar_lea.vmem (!%p1735_p6), [#allocation4], %s1050_s19 }
  0x7e   : > { %1481 = dma.done.wait (%p1802_p13), %s329_s14, 512  }
  0x7f   : > { %1483 = vsyncadd (%p1802_p13), %s329_s14, 4294966784  ;;  %s337_s30 = sand.u32 1, %s1793_s8   ;;  %s339_s13 = sand.u32 1, %s1518_s22  }
  0x80   : > { %s1051_s4 = sshll.u32 %s339_s13, 9  ;;  %s338_s11 = scalar_lea.sflag [#allocation8], %s337_s30 }
  0x81   : > { %s1861_s1 = scalar_lea.vmem [#allocation7], %s1051_s4 }
  0x82   : > { %1485 = dma.done.wait (%p1809_p11), %s338_s11, 8192  }
  0x83   : > { %1487 = vsyncadd (%p1809_p11), %s338_s11, 4294959104  ;;  %s1052_s2 = sshll.u32 %s328_s9, 8 }
  0x84   : > { %s1867_s5 = scalar_lea.vmem [#allocation9], %s1052_s2 }
  0x85   : > { %1489 = dma.done.wait (%p1802_p13), %s338_s11, 4096  }
  0x86   : > { %1491 = vsyncadd (%p1802_p13), %s338_s11, 4294963200  ;;  %s2182_s8 = sld [smem:[#allocation19_spill]] }
  0x8c   : > { %s1874_s3 = sand.u32 1, %s2182_s8  }
  0x8d   : > { %s1053_s7 = sshll.u32 %s1874_s3, 8  ;;  %s356_s27 = scalar_lea.sflag [#allocation11], %s1874_s3 }
  0x8e   : > { %s1878_s17 = scalar_lea.vmem [#allocation10], %s1053_s7 }
  0x8f   : > { %1493 = dma.done.wait (%p1823_p7), %s356_s27, 4096  }
  0x90   : > { %1495 = vsyncadd (%p1823_p7), %s356_s27, 4294963200  ;;  %s2183_s18 = sld [smem:[#allocation21_spill]]  ;;  %s1054_s9 = sshll.u32 %s1874_s3, 5 }
  0x91   : > { %s2184_s30 = sld [smem:[#allocation29_spill]]  ;;  %s1892_s4 = scalar_lea.vmem [#allocation12], %s1054_s9 }
  0x92   : > { %s2185_s11 = sld [smem:[#allocation20_spill]] }
  0x96   : > { %s1055_s10 = sshll.u32 %s2183_s18, 1 }
  0x97   : > { %p412_p6 = scmp.lt.s32.totalorder %s1055_s10, 3 }
  0x98   : > { %p1056_p13 = scmp.ne.s32.totalorder %s2185_s11, 0 }
  0x99   : > { %s2217_s10 = smov (!%p412_p6, %s1055_s10), 3 }
  0x9a   : > { %s414_s13 = scalar_lea.vmem %s2184_s30, %s2217_s10  ;;  %421 = sbr.rel (%p1056_p13) target bundleno = 163 (0xa3), region = 60 }
  0x9f   : > { %v1565_v0 = vmov 0.0  }
  0xa0   : > { %422 = vst [vmem:[#allocation2 + $0x10] sm:$0xff] %v1565_v0  ;;  %423 = vst [vmem:[#allocation2] sm:$0xff] %v1565_v0 }
  0xa1   : > { %424 = vst [vmem:[#allocation2 + $0x18] sm:$0xff] %v1565_v0  ;;  %425 = vst [vmem:[#allocation2 + $0x8] sm:$0xff] %v1565_v0 }
  0xa2   : > { %426 = vst [vmem:[#allocation3] sm:$0xff] %v1565_v0  ;;  %427 = vst [vmem:[#allocation3 + $0x8] sm:$0xff] %v1565_v0 }
  0xa3 PF: > { %v467_v1 = vld [vmem:[%s1861_s1 + $0xf8] sm:$0xff]  ;;  %v466_v2 = vld [vmem:[%s1861_s1 + $0xf0] sm:$0xff]  ;;  %v465_v3 = vld [vmem:[%s1861_s1 + $0xe8] sm:$0xff]  ;;  %s2186_s24 = sld [smem:[#allocation20_spill]] }
  0xa4   : > { %500 = vmatprep.subr.mxu0 %v467_v1  ;;  %v464_v4 = vld [vmem:[%s1861_s1 + $0xe0] sm:$0xff]  ;;  %v463_v5 = vld [vmem:[%s1861_s1 + $0xd8] sm:$0xff]  ;;  %v462_v6 = vld [vmem:[%s1861_s1 + $0xd0] sm:$0xff] }
  0xa5   : > { %501 = vmatpush1.xpose.msra.mxu0 %v466_v2  ;;  %v461_v7 = vld [vmem:[%s1861_s1 + $0xc8] sm:$0xff]  ;;  %v460_v8 = vld [vmem:[%s1861_s1 + $0xc0] sm:$0xff]  ;;  %v618_v9 = vld [vmem:[%s1867_s5 + $0xf8] sm:$0xff] }
  0xa6   : > { %502 = vmatprep.subr.mxu0 %v465_v3  ;;  %v617_v10 = vld [vmem:[%s1867_s5 + $0xf0] sm:$0xff]  ;;  %v459_v11 = vld [vmem:[%s1861_s1 + $0xb8] sm:$0xff]  ;;  %619 = vmatprep.subr.mxu1 %v618_v9  ;;  %v616_v12 = vld [vmem:[%s1867_s5 + $0xe8] sm:$0xff] }
  0xa7   : > { %620 = vmatpush1.xpose.msra.mxu1 %v617_v10  ;;  %v615_v13 = vld [vmem:[%s1867_s5 + $0xe0] sm:$0xff]  ;;  %v458_v14 = vld [vmem:[%s1861_s1 + $0xb0] sm:$0xff]  ;;  %v614_v15 = vld [vmem:[%s1867_s5 + $0xd8] sm:$0xff] }
  0xa8   : > { %621 = vmatprep.subr.mxu1 %v616_v12  ;;  %v457_v16 = vld [vmem:[%s1861_s1 + $0xa8] sm:$0xff]  ;;  %v613_v17 = vld [vmem:[%s1867_s5 + $0xd0] sm:$0xff]  ;;  %v456_v18 = vld [vmem:[%s1861_s1 + $0xa0] sm:$0xff] }
  0xa9   : > { %503 = vmatpush1.xpose.msra.mxu0 %v464_v4  ;;  %v612_v19 = vld [vmem:[%s1867_s5 + $0xc8] sm:$0xff]  ;;  %v455_v20 = vld [vmem:[%s1861_s1 + $0x98] sm:$0xff]  ;;  %v611_v21 = vld [vmem:[%s1867_s5 + $0xc0] sm:$0xff]  ;;  %p1057_p7 = scmp.ne.s32.totalorder %s2186_s24, 1 }
  0xaa   : > { %504 = vmatprep.subr.mxu0 %v463_v5  ;;  %v454_v22 = vld [vmem:[%s1861_s1 + $0x90] sm:$0xff]  ;;  %v610_v23 = vld [vmem:[%s1867_s5 + $0xb8] sm:$0xff]  ;;  %v453_v24 = vld [vmem:[%s1861_s1 + $0x88] sm:$0xff] }
  0xab   : > { %622 = vmatpush1.xpose.msra.mxu1 %v615_v13  ;;  %v609_v25 = vld [vmem:[%s1867_s5 + $0xb0] sm:$0xff]  ;;  %v452_v26 = vld [vmem:[%s1861_s1 + $0x80] sm:$0xff]  ;;  %v608_v27 = vld [vmem:[%s1867_s5 + $0xa8] sm:$0xff] }
  0xac   : > { %623 = vmatprep.subr.mxu1 %v614_v15  ;;  %v451_v28 = vld [vmem:[%s1861_s1 + $0x78] sm:$0xff]  ;;  %v607_v29 = vld [vmem:[%s1867_s5 + $0xa0] sm:$0xff]  ;;  %v450_v30 = vld [vmem:[%s1861_s1 + $0x70] sm:$0xff] }
  0xad   : > { %505 = vmatpush1.xpose.msra.mxu0 %v462_v6  ;;  %v606_v31 = vld [vmem:[%s1867_s5 + $0x98] sm:$0xff]  ;;  %v449_v32 = vld [vmem:[%s1861_s1 + $0x68] sm:$0xff]  ;;  %v605_v34 = vld [vmem:[%s1867_s5 + $0x90] sm:$0xff] }
  0xae   : > { %506 = vmatprep.subr.mxu0 %v461_v7  ;;  %v429_v33 = vld [vmem:[%s1853_s28 + $0x8] sm:$0xff]  ;;  %v448_v35 = vld [vmem:[%s1861_s1 + $0x60] sm:$0xff]  ;;  %v447_v37 = vld [vmem:[%s1861_s1 + $0x58] sm:$0xff] }
  0xaf   : > { %624 = vmatpush1.xpose.msra.mxu1 %v613_v17  ;;  %564 = vmatprep.mubr.f32.mxu0 %v429_v33  ;;  %v604_v36 = vld [vmem:[%s1867_s5 + $0x88] sm:$0xff]  ;;  %v603_v38 = vld [vmem:[%s1867_s5 + $0x80] sm:$0xff]  ;;  %v446_v39 = vld [vmem:[%s1861_s1 + $0x50] sm:$0xff] }
  0xb0   : > { %625 = vmatprep.subr.mxu1 %v612_v19  ;;  %683 = vmatprep.mubr.f32.mxu1 %v429_v33  ;;  %v602_v40 = vld [vmem:[%s1867_s5 + $0x78] sm:$0xff]  ;;  %v445_v41 = vld [vmem:[%s1861_s1 + $0x48] sm:$0xff]  ;;  %v601_v42 = vld [vmem:[%s1867_s5 + $0x70] sm:$0xff] }
  0xb1   : > { %507 = vmatpush1.xpose.msra.mxu0 %v460_v8  ;;  %v444_v43 = vld [vmem:[%s1861_s1 + $0x40] sm:$0xff]  ;;  %v600_v44 = vld [vmem:[%s1867_s5 + $0x68] sm:$0xff]  ;;  %v443_v45 = vld [vmem:[%s1861_s1 + $0x38] sm:$0xff] }
  0xb2   : > { %508 = vmatprep.subr.mxu0 %v459_v11  ;;  %v599_v46 = vld [vmem:[%s1867_s5 + $0x60] sm:$0xff]  ;;  %v442_v47 = vld [vmem:[%s1861_s1 + $0x30] sm:$0xff]  ;;  %v598_v48 = vld [vmem:[%s1867_s5 + $0x58] sm:$0xff] }
  0xb3   : > { %626 = vmatpush1.xpose.msra.mxu1 %v611_v21  ;;  %v441_v49 = vld [vmem:[%s1861_s1 + $0x28] sm:$0xff]  ;;  %v597_v50 = vld [vmem:[%s1867_s5 + $0x50] sm:$0xff]  ;;  %v440_v51 = vld [vmem:[%s1861_s1 + $0x20] sm:$0xff] }
  0xb4   : > { %627 = vmatprep.subr.mxu1 %v610_v23  ;;  %v596_v52 = vld [vmem:[%s1867_s5 + $0x48] sm:$0xff]  ;;  %v439_v53 = vld [vmem:[%s1861_s1 + $0x18] sm:$0xff]  ;;  %v595_v54 = vld [vmem:[%s1867_s5 + $0x40] sm:$0xff] }
  0xb5   : > { %509 = vmatpush1.xpose.msra.mxu0 %v458_v14  ;;  %v438_v55 = vld [vmem:[%s1861_s1 + $0x10] sm:$0xff]  ;;  %v594_v56 = vld [vmem:[%s1867_s5 + $0x38] sm:$0xff]  ;;  %v437_v57 = vld [vmem:[%s1861_s1 + $0x8] sm:$0xff] }
  0xb6   : > { %510 = vmatprep.subr.mxu0 %v457_v16  ;;  %v593_v58 = vld [vmem:[%s1867_s5 + $0x30] sm:$0xff]  ;;  %v436_v59 = vld [vmem:[%s1861_s1] sm:$0xff]  ;;  %v592_v60 = vld [vmem:[%s1867_s5 + $0x28] sm:$0xff] }
  0xb7   : > { %628 = vmatpush1.xpose.msra.mxu1 %v609_v25  ;;  %v499_v61 = vld [vmem:[%s1861_s1 + $0x1f8] sm:$0xff]  ;;  %v591_v62 = vld [vmem:[%s1867_s5 + $0x20] sm:$0xff]  ;;  %v498_v63 = vld [vmem:[%s1861_s1 + $0x1f0] sm:$0xff] }
  0xb8   : > { %629 = vmatprep.subr.mxu1 %v608_v27  ;;  %v590_v0 = vld [vmem:[%s1867_s5 + $0x18] sm:$0xff]  ;;  %v497_v1 = vld [vmem:[%s1861_s1 + $0x1e8] sm:$0xff]  ;;  %v589_v2 = vld [vmem:[%s1867_s5 + $0x10] sm:$0xff] }
  0xb9   : > { %511 = vmatpush1.xpose.msra.mxu0 %v456_v18  ;;  %v496_v3 = vld [vmem:[%s1861_s1 + $0x1e0] sm:$0xff]  ;;  %v588_v4 = vld [vmem:[%s1867_s5 + $0x8] sm:$0xff]  ;;  %v495_v5 = vld [vmem:[%s1861_s1 + $0x1d8] sm:$0xff] }
  0xba   : > { %512 = vmatprep.subr.mxu0 %v455_v20  ;;  %v587_v6 = vld [vmem:[%s1867_s5] sm:$0xff]  ;;  %v494_v7 = vld [vmem:[%s1861_s1 + $0x1d0] sm:$0xff]  ;;  %v493_v8 = vld [vmem:[%s1861_s1 + $0x1c8] sm:$0xff] }
  0xbb   : > { %630 = vmatpush1.xpose.msra.mxu1 %v607_v29  ;;  %v428_v9 = vld [vmem:[%s1853_s28] sm:$0xff]  ;;  %v431_v10 = vld [vmem:[%s1853_s28 + $0x18] sm:$0xff]  ;;  %v430_v13 = vld [vmem:[%s1853_s28 + $0x10] sm:$0xff] }
  0xbc   : > { %631 = vmatprep.subr.mxu1 %v606_v31  ;;  %v492_v11 = vld [vmem:[%s1861_s1 + $0x1c0] sm:$0xff]  ;;  %v491_v12 = vld [vmem:[%s1861_s1 + $0x1b8] sm:$0xff]  ;;  %v490_v14 = vld [vmem:[%s1861_s1 + $0x1b0] sm:$0xff] }
  0xbd   : > { %513 = vmatpush1.xpose.msra.mxu0 %v454_v22  ;;  %v489_v15 = vld [vmem:[%s1861_s1 + $0x1a8] sm:$0xff]  ;;  %v488_v16 = vld [vmem:[%s1861_s1 + $0x1a0] sm:$0xff]  ;;  %v487_v17 = vld [vmem:[%s1861_s1 + $0x198] sm:$0xff] }
  0xbe   : > { %514 = vmatprep.subr.mxu0 %v453_v24  ;;  %v486_v18 = vld [vmem:[%s1861_s1 + $0x190] sm:$0xff]  ;;  %v485_v19 = vld [vmem:[%s1861_s1 + $0x188] sm:$0xff]  ;;  %v484_v20 = vld [vmem:[%s1861_s1 + $0x180] sm:$0xff] }
  0xbf   : > { %632 = vmatpush1.xpose.msra.mxu1 %v605_v34  ;;  %v483_v21 = vld [vmem:[%s1861_s1 + $0x178] sm:$0xff]  ;;  %v482_v22 = vld [vmem:[%s1861_s1 + $0x170] sm:$0xff]  ;;  %v481_v23 = vld [vmem:[%s1861_s1 + $0x168] sm:$0xff] }
  0xc0   : > { %633 = vmatprep.subr.mxu1 %v604_v36  ;;  %v480_v24 = vld [vmem:[%s1861_s1 + $0x160] sm:$0xff]  ;;  %v479_v25 = vld [vmem:[%s1861_s1 + $0x158] sm:$0xff]  ;;  %v477_v27 = vld [vmem:[%s1861_s1 + $0x148] sm:$0xff] }
  0xc1   : > { %515 = vmatpush1.xpose.msra.mxu0 %v452_v26  ;;  %v478_v26 = vld [vmem:[%s1861_s1 + $0x150] sm:$0xff]  ;;  %v475_v29 = vld [vmem:[%s1861_s1 + $0x138] sm:$0xff]  ;;  %v473_v31 = vld [vmem:[%s1861_s1 + $0x128] sm:$0xff] }
  0xc2   : > { %516 = vmatprep.subr.mxu0 %v451_v28  ;;  %v476_v28 = vld [vmem:[%s1861_s1 + $0x140] sm:$0xff]  ;;  %v471_v33 = vld [vmem:[%s1861_s1 + $0x118] sm:$0xff]  ;;  %v470_v34 = vld [vmem:[%s1861_s1 + $0x110] sm:$0xff] }
  0xc3   : > { %634 = vmatpush1.xpose.msra.mxu1 %v603_v38  ;;  %v468_v36 = vld [vmem:[%s1861_s1 + $0x100] sm:$0xff] }
  0xc4   : > { %635 = vmatprep.subr.mxu1 %v602_v40 }
  0xc5   : > { %517 = vmatpush1.xpose.msra.mxu0 %v450_v30  ;;  %v474_v30 = vld [vmem:[%s1861_s1 + $0x130] sm:$0xff] }
  0xc6   : > { %518 = vmatprep.subr.mxu0 %v449_v32  ;;  %v472_v32 = vld [vmem:[%s1861_s1 + $0x120] sm:$0xff] }
  0xc7   : > { %636 = vmatpush1.xpose.msra.mxu1 %v601_v42 }
  0xc8   : > { %637 = vmatprep.subr.mxu1 %v600_v44 }
  0xc9   : > { %519 = vmatpush1.xpose.msra.mxu0 %v448_v35  ;;  %v469_v35 = vld [vmem:[%s1861_s1 + $0x108] sm:$0xff] }
  0xca   : > { %520 = vmatprep.subr.mxu0 %v447_v37  ;;  %v585_v37 = vld [vmem:[#allocation3] sm:$0xff] }
  0xcb   : > { %638 = vmatpush1.xpose.msra.mxu1 %v599_v46 }
  0xcc   : > { %639 = vmatprep.subr.mxu1 %v598_v48 }
  0xcd   : > { %521 = vmatpush1.xpose.msra.mxu0 %v446_v39 }
  0xce   : > { %522 = vmatprep.subr.mxu0 %v445_v41  ;;  %v586_v41 = vld [vmem:[#allocation3 + $0x8] sm:$0xff] }
  0xcf   : > { %640 = vmatpush1.xpose.msra.mxu1 %v597_v50  ;;  %v434_v50 = vld [vmem:[#allocation2 + $0x18] sm:$0xff] }
  0xd0   : > { %641 = vmatprep.subr.mxu1 %v596_v52 }
  0xd1   : > { %523 = vmatpush1.xpose.msra.mxu0 %v444_v43 }
  0xd2   : > { %524 = vmatprep.subr.mxu0 %v443_v45  ;;  %v432_v45 = vld [vmem:[#allocation2 + $0x10] sm:$0xff] }
  0xd3   : > { %642 = vmatpush1.xpose.msra.mxu1 %v595_v54 }
  0xd4   : > { %643 = vmatprep.subr.mxu1 %v594_v56 }
  0xd5   : > { %525 = vmatpush1.xpose.msra.mxu0 %v442_v47  ;;  %v433_v47 = vld [vmem:[#allocation2] sm:$0xff] }
  0xd6   : > { %526 = vmatprep.subr.mxu0 %v441_v49 }
  0xd7   : > { %644 = vmatpush1.xpose.msra.mxu1 %v593_v58 }
  0xd8   : > { %645 = vmatprep.subr.mxu1 %v592_v60 }
  0xd9   : > { %527 = vmatpush1.xpose.msra.mxu0 %v440_v51 }
  0xda   : > { %528 = vmatprep.subr.mxu0 %v439_v53  ;;  %v435_v53 = vld [vmem:[#allocation2 + $0x8] sm:$0xff] }
  0xdb   : > { %646 = vmatpush1.xpose.msra.mxu1 %v591_v62 }
  0xdc   : > { %647 = vmatprep.subr.mxu1 %v590_v0 }
  0xdd   : > { %529 = vmatpush1.xpose.msra.mxu0 %v438_v55 }
  0xde   : > { %530 = vmatprep.subr.mxu0 %v437_v57 }
  0xdf   : > { %648 = vmatpush1.xpose.msra.mxu1 %v589_v2 }
  0xe0   : > { %649 = vmatprep.subr.mxu1 %v588_v4 }
  0xe1   : > { %531 = vmatpush1.xpose.msra.mxu0 %v436_v59 }
  0xe2   : > { %532 = vmatprep.subr.mxu0 %v499_v61 }
  0xe3   : > { %650 = vmatpush1.xpose.msra.mxu1 %v587_v6 }
  0xe5   : > { %533 = vmatpush2.xpose.msra.mxu0 %v498_v63 }
  0xe6   : > { %534 = vmatprep.subr.mxu0 %v497_v1  ;;  %684 = vmatmul.mubr.f32.vlgmr.msra.gmra.mxu1 %v428_v9 }
  0xe7   : > { %688 = vmatprep.mubr.f32.mxu1 %v431_v10 }
  0xe9   : > { %535 = vmatpush2.xpose.msra.mxu0 %v496_v3 }
  0xea   : > { %536 = vmatprep.subr.mxu0 %v495_v5  ;;  %689 = vmatmul.mubr.f32.gmra.mxu1 %v430_v13 }
  0xed   : > { %537 = vmatpush2.xpose.msra.mxu0 %v494_v7 }
  0xee   : > { %538 = vmatprep.subr.mxu0 %v493_v8 }
  0xf1   : > { %539 = vmatpush2.xpose.msra.mxu0 %v492_v11 }
  0xf2   : > { %540 = vmatprep.subr.mxu0 %v491_v12 }
  0xf5   : > { %541 = vmatpush2.xpose.msra.mxu0 %v490_v14 }
  0xf6   : > { %542 = vmatprep.subr.mxu0 %v489_v15 }
  0xf9   : > { %543 = vmatpush2.xpose.msra.mxu0 %v488_v16 }
  0xfa   : > { %544 = vmatprep.subr.mxu0 %v487_v17 }
  0xfd   : > { %545 = vmatpush2.xpose.msra.mxu0 %v486_v18 }
  0xfe   : > { %546 = vmatprep.subr.mxu0 %v485_v19 }
 0x101   : > { %547 = vmatpush2.xpose.msra.mxu0 %v484_v20 }
 0x102   : > { %548 = vmatprep.subr.mxu0 %v483_v21 }
 0x105   : > { %549 = vmatpush2.xpose.msra.mxu0 %v482_v22 }
 0x106   : > { %550 = vmatprep.subr.mxu0 %v481_v23 }
 0x109   : > { %551 = vmatpush2.xpose.msra.mxu0 %v480_v24 }
 0x10a   : > { %552 = vmatprep.subr.mxu0 %v479_v25 }
 0x10d   : > { %553 = vmatpush2.xpose.msra.mxu0 %v478_v26 }
 0x10e   : > { %554 = vmatprep.subr.mxu0 %v477_v27 }
 0x111   : > { %555 = vmatpush2.xpose.msra.mxu0 %v476_v28 }
 0x112   : > { %556 = vmatprep.subr.mxu0 %v475_v29 }
 0x115   : > { %557 = vmatpush2.xpose.msra.mxu0 %v474_v30 }
 0x116   : > { %558 = vmatprep.subr.mxu0 %v473_v31 }
 0x119   : > { %559 = vmatpush2.xpose.msra.mxu0 %v472_v32 }
 0x11a   : > { %560 = vmatprep.subr.mxu0 %v471_v33 }
 0x11d   : > { %561 = vmatpush2.xpose.msra.mxu0 %v470_v34 }
 0x11e   : > { %562 = vmatprep.subr.mxu0 %v469_v35 }
 0x121   : > { %563 = vmatpush2.xpose.msra.mxu0 %v468_v36 }
 0x124   : > { %565 = vmatmul.mubr.f32.vlgmr.msra.gmra.mxu0 %v428_v9 }
 0x125   : > { %570 = vmatprep.mubr.f32.mxu0 %v431_v10 }
 0x128   : > { %571 = vmatmul.mubr.f32.gmra.mxu0 %v430_v13 }
 0x1a6   : > { %v685_v38 = vpop.f32.mrf.mxu1 }
 0x1a7   : > { %v694_v39 = vadd.f32 %v685_v38, %v585_v37 }
 0x1a8   : > { %v687_v40 = vpop.f32.mrf.mxu1 }
 0x1a9   : > { %696 = vst [vmem:[#allocation3] sm:$0xff] %v694_v39 }
 0x1aa   : > { %v690_v42 = vpop.f32.mrf.mxu1 }
 0x1ab   : > { %v695_v43 = vadd.f32 %v690_v42, %v586_v41 }
 0x1ac   : > { %v692_v44 = vpop.f32.mrf.mxu1 }
 0x1ad   : > { %697 = vst [vmem:[#allocation3 + $0x8] sm:$0xff] %v695_v43 }
 0x1e4   : > { %v566_v46 = vpop.f32.mrf.mxu0 }
 0x1e5   : > { %v577_v48 = vadd.f32 %v566_v46, %v432_v45 }
 0x1e6   : > { %v568_v49 = vpop.f32.mrf.mxu0 }
 0x1e7   : > { %581 = vst [vmem:[#allocation2 + $0x10] sm:$0xff] %v577_v48  ;;  %v578_v51 = vadd.f32 %v568_v49, %v433_v47 }
 0x1e8   : > { %v572_v52 = vpop.f32.mrf.mxu0 }
 0x1e9   : > { %582 = vst [vmem:[#allocation2] sm:$0xff] %v578_v51  ;;  %v579_v54 = vadd.f32 %v572_v52, %v434_v50  ;;  %701 = sbr.rel (%p1057_p7) target bundleno = 759 (0x2f7), region = 64 }
 0x1ea   : > { %v574_v55 = vpop.f32.mrf.mxu0 }
 0x1eb   : > { %583 = vst [vmem:[#allocation2 + $0x18] sm:$0xff] %v579_v54  ;;  %v580_v56 = vadd.f32 %v574_v55, %v435_v53 }
 0x1ed   : > { %584 = vst [vmem:[#allocation2 + $0x8] sm:$0xff] %v580_v56 }
 0x1ee   : > { %v737_v57 = vld [vmem:[%s1878_s17 + $0xf8] sm:$0xff]  ;;  %v736_v59 = vld [vmem:[%s1878_s17 + $0xf0] sm:$0xff]  ;;  %v735_v61 = vld [vmem:[%s1878_s17 + $0xe8] sm:$0xff]  ;;  %v825_v29 = vlaneseq }
 0x1ef   : > { %v721_v58 = vld [vmem:[%s1878_s17 + $0x78] sm:$0xff]  ;;  %1068 = vmatprep.subr.mxu0 %v737_v57  ;;  %1104 = vmatprep.subr.mxu1 %v737_v57  ;;  %v720_v60 = vld [vmem:[%s1878_s17 + $0x70] sm:$0xff]  ;;  %v719_v62 = vld [vmem:[%s1878_s17 + $0x68] sm:$0xff] }
 0x1f0   : > { %1069 = vmatpush3.xpose.msra.mxu0 %v721_v58  ;;  %1120 = vmatpush3.xpose.msra.mxu1 %v721_v58  ;;  %v734_v63 = vld [vmem:[%s1878_s17 + $0xe0] sm:$0xff]  ;;  %v702_v0 = vld [vmem:[#allocation3] sm:$0xff]  ;;  %v703_v3 = vld [vmem:[#allocation3 + $0x8] sm:$0xff]  ;;  %v826_v30 = vshrl.u32 %v825_v29, 7 }
 0x1f1   : > { %1070 = vmatprep.subr.mxu0 %v736_v59  ;;  %1105 = vmatprep.subr.mxu1 %v736_v59  ;;  %v718_v1 = vld [vmem:[%s1878_s17 + $0x60] sm:$0xff]  ;;  %v2004_v2 = vmul.f32 2.0, %v702_v0  ;;  %v733_v4 = vld [vmem:[%s1878_s17 + $0xd8] sm:$0xff]  ;;  %v2007_v5 = vmul.f32 2.0, %v703_v3  ;;  %v732_v7 = vld [vmem:[%s1878_s17 + $0xd0] sm:$0xff] }
 0x1f2   : > { %v717_v6 = vld [vmem:[%s1878_s17 + $0x58] sm:$0xff]  ;;  %v716_v8 = vld [vmem:[%s1878_s17 + $0x50] sm:$0xff]  ;;  %v731_v9 = vld [vmem:[%s1878_s17 + $0xc8] sm:$0xff]  ;;  %v827_v31 = vsub.s32 0, %v826_v30  ;;  %v831_v33 = vsub.s32 1, %v826_v30 }
 0x1f3   : > { %1100 = vmatprep.mubr.f32.mxu0 %v2004_v2  ;;  %1102 = vmatprep.mubr.f32.mxu1 %v2007_v5  ;;  %v715_v10 = vld [vmem:[%s1878_s17 + $0x48] sm:$0xff]  ;;  %v730_v11 = vld [vmem:[%s1878_s17 + $0xc0] sm:$0xff]  ;;  %v729_v13 = vld [vmem:[%s1878_s17 + $0xb8] sm:$0xff] }
 0x1f4   : > { %1071 = vmatpush3.xpose.msra.mxu0 %v720_v60  ;;  %1121 = vmatpush3.xpose.msra.mxu1 %v720_v60  ;;  %v714_v12 = vld [vmem:[%s1878_s17 + $0x40] sm:$0xff]  ;;  %v713_v14 = vld [vmem:[%s1878_s17 + $0x38] sm:$0xff]  ;;  %v728_v15 = vld [vmem:[%s1878_s17 + $0xb0] sm:$0xff] }
 0x1f5   : > { %1072 = vmatprep.subr.mxu0 %v735_v61  ;;  %1106 = vmatprep.subr.mxu1 %v735_v61  ;;  %v712_v16 = vld [vmem:[%s1878_s17 + $0x30] sm:$0xff]  ;;  %v727_v17 = vld [vmem:[%s1878_s17 + $0xa8] sm:$0xff]  ;;  %v726_v19 = vld [vmem:[%s1878_s17 + $0xa0] sm:$0xff] }
 0x1f6   : > { %v711_v18 = vld [vmem:[%s1878_s17 + $0x28] sm:$0xff]  ;;  %v710_v20 = vld [vmem:[%s1878_s17 + $0x20] sm:$0xff]  ;;  %v725_v21 = vld [vmem:[%s1878_s17 + $0x98] sm:$0xff] }
 0x1f7   : > { %v709_v22 = vld [vmem:[%s1878_s17 + $0x18] sm:$0xff]  ;;  %v724_v23 = vld [vmem:[%s1878_s17 + $0x90] sm:$0xff]  ;;  %v723_v25 = vld [vmem:[%s1878_s17 + $0x88] sm:$0xff] }
 0x1f8   : > { %1073 = vmatpush3.xpose.msra.mxu0 %v719_v62  ;;  %1122 = vmatpush3.xpose.msra.mxu1 %v719_v62  ;;  %v708_v24 = vld [vmem:[%s1878_s17 + $0x10] sm:$0xff]  ;;  %v707_v26 = vld [vmem:[%s1878_s17 + $0x8] sm:$0xff]  ;;  %v722_v27 = vld [vmem:[%s1878_s17 + $0x80] sm:$0xff] }
 0x1f9   : > { %1074 = vmatprep.subr.mxu0 %v734_v63  ;;  %1107 = vmatprep.subr.mxu1 %v734_v63  ;;  %v706_v28 = vld [vmem:[%s1878_s17] sm:$0xff]  ;;  %v823_v32 = vld [vmem:[%s414_s13] sm:$0x3]  ;;  %v817_v35 = vld [vmem:[#allocation2 + $0x18] sm:$0xff] }
 0x1fa   : > { %v815_v34 = vld [vmem:[#allocation2 + $0x10] sm:$0xff]  ;;  %v828_v36 = vrot.slane %v823_v32, %v827_v31  ;;  %v816_v39 = vld [vmem:[#allocation2] sm:$0xff]  ;;  %v818_v40 = vld [vmem:[#allocation2 + $0x8] sm:$0xff]  ;;  %v832_v43 = vrot.slane %v823_v32, %v831_v33 }
 0x1fc   : > { %1075 = vmatpush3.xpose.msra.mxu0 %v718_v1  ;;  %1123 = vmatpush3.xpose.msra.mxu1 %v718_v1 }
 0x1fd   : > { %1076 = vmatprep.subr.mxu0 %v733_v4  ;;  %1108 = vmatprep.subr.mxu1 %v733_v4 }
 0x200   : > { %1077 = vmatpush3.xpose.msra.mxu0 %v717_v6  ;;  %1124 = vmatpush3.xpose.msra.mxu1 %v717_v6 }
 0x201   : > { %1078 = vmatprep.subr.mxu0 %v732_v7  ;;  %1109 = vmatprep.subr.mxu1 %v732_v7 }
 0x204   : > { %1079 = vmatpush3.xpose.msra.mxu0 %v716_v8  ;;  %1125 = vmatpush3.xpose.msra.mxu1 %v716_v8 }
 0x205   : > { %1080 = vmatprep.subr.mxu0 %v731_v9  ;;  %1110 = vmatprep.subr.mxu1 %v731_v9 }
 0x208   : > { %1081 = vmatpush3.xpose.msra.mxu0 %v715_v10  ;;  %1126 = vmatpush3.xpose.msra.mxu1 %v715_v10 }
 0x209   : > { %1082 = vmatprep.subr.mxu0 %v730_v11  ;;  %1111 = vmatprep.subr.mxu1 %v730_v11 }
 0x20c   : > { %1083 = vmatpush3.xpose.msra.mxu0 %v714_v12  ;;  %1127 = vmatpush3.xpose.msra.mxu1 %v714_v12 }
 0x20d   : > { %1084 = vmatprep.subr.mxu0 %v729_v13  ;;  %1112 = vmatprep.subr.mxu1 %v729_v13 }
 0x210   : > { %1085 = vmatpush3.xpose.msra.mxu0 %v713_v14  ;;  %1128 = vmatpush3.xpose.msra.mxu1 %v713_v14 }
 0x211   : > { %1086 = vmatprep.subr.mxu0 %v728_v15  ;;  %1113 = vmatprep.subr.mxu1 %v728_v15 }
 0x214   : > { %1087 = vmatpush3.xpose.msra.mxu0 %v712_v16  ;;  %1129 = vmatpush3.xpose.msra.mxu1 %v712_v16 }
 0x215   : > { %1088 = vmatprep.subr.mxu0 %v727_v17  ;;  %1114 = vmatprep.subr.mxu1 %v727_v17 }
 0x218   : > { %1089 = vmatpush3.xpose.msra.mxu0 %v711_v18  ;;  %1130 = vmatpush3.xpose.msra.mxu1 %v711_v18 }
 0x219   : > { %1090 = vmatprep.subr.mxu0 %v726_v19  ;;  %1115 = vmatprep.subr.mxu1 %v726_v19 }
 0x21c   : > { %1091 = vmatpush3.xpose.msra.mxu0 %v710_v20  ;;  %1131 = vmatpush3.xpose.msra.mxu1 %v710_v20 }
 0x21d   : > { %1092 = vmatprep.subr.mxu0 %v725_v21  ;;  %1116 = vmatprep.subr.mxu1 %v725_v21 }
 0x220   : > { %1093 = vmatpush3.xpose.msra.mxu0 %v709_v22  ;;  %1132 = vmatpush3.xpose.msra.mxu1 %v709_v22 }
 0x221   : > { %1094 = vmatprep.subr.mxu0 %v724_v23  ;;  %1117 = vmatprep.subr.mxu1 %v724_v23 }
 0x224   : > { %1095 = vmatpush3.xpose.msra.mxu0 %v708_v24  ;;  %1133 = vmatpush3.xpose.msra.mxu1 %v708_v24 }
 0x225   : > { %1096 = vmatprep.subr.mxu0 %v723_v25  ;;  %1118 = vmatprep.subr.mxu1 %v723_v25 }
 0x228   : > { %1097 = vmatpush3.xpose.msra.mxu0 %v707_v26  ;;  %1134 = vmatpush3.xpose.msra.mxu1 %v707_v26 }
 0x229   : > { %1098 = vmatprep.subr.mxu0 %v722_v27  ;;  %1119 = vmatprep.subr.mxu1 %v722_v27 }
 0x22c   : > { %1099 = vmatpush3.xpose.msra.mxu0 %v706_v28  ;;  %1135 = vmatpush3.xpose.msra.mxu1 %v706_v28 }
 0x22f   : > { %1101 = vmatmul.mubr.f32.vlgmr.msra.gmra.mxu0 %v2004_v2  ;;  %1103 = vmatmul.mubr.f32.vlgmr.msra.gmra.mxu1 %v2007_v5 }
 0x2ef   : > { %v804_v37 = vpop.f32.mrf.mxu0  ;;  %v810_v38 = vpop.f32.mrf.mxu1 }
 0x2f0   : > { %v819_v41 = vadd.f32 %v815_v34, %v804_v37  ;;  %v821_v42 = vadd.f32 %v817_v35, %v810_v38 }
 0x2f1   : > { %v806_v44 = vpop.f32.mrf.mxu0  ;;  %v812_v45 = vpop.f32.mrf.mxu1 }
 0x2f2   : > { %v835_v46 = vadd.f32 %v828_v36, %v819_v41  ;;  %v837_v47 = vadd.f32 %v828_v36, %v821_v42  ;;  %v820_v48 = vadd.f32 %v816_v39, %v806_v44  ;;  %v822_v49 = vadd.f32 %v818_v40, %v812_v45 }
 0x2f4   : > { %839 = vst [vmem:[%s1892_s4] sm:$0xff] %v835_v46  ;;  %841 = vst [vmem:[%s1892_s4 + $0x10] sm:$0xff] %v837_v47  ;;  %v836_v50 = vadd.f32 %v832_v43, %v820_v48  ;;  %v838_v51 = vadd.f32 %v832_v43, %v822_v49 }
 0x2f6   : > { %840 = vst [vmem:[%s1892_s4 + $0x8] sm:$0xff] %v836_v50  ;;  %842 = vst [vmem:[%s1892_s4 + $0x18] sm:$0xff] %v838_v51 }
 0x2f7 PF: > { %s2188_s5 = sld [smem:[#allocation21_spill]]  ;;  %s860_s9 = sshll.u32 %s1892_s4, 4  ;;  %s2052_s9 = int_to_ptr.vmem [resolvable:$true] %s860_s9 }
 0x2f8   : > { %s2189_s17 = sld [smem:[#allocation30_spill]]  ;;  %s844_s10 = scalar_lea.sflag [#allocation6], %s1874_s3 }
 0x2f9   : > { %s1398_s19 = scalar_lea.vmem %s2052_s9, 512  ;;  %p2190_p0 = scmp.ne.s32.totalorder %s2177_s12, 0 }
 0x2fa   : > { %p1399_p11 = scmp.ne.s32.totalorder %s2052_s9, %s1398_s19  ;;  %s1566_s14 = smov [#allocation12]  }
 0x2fb   : > { %s1402_s30 = sshll.u32 %s1566_s14, 4  ;;  %s1403_s30 = int_to_ptr.vmem [resolvable:$false] %s1402_s30 }
 0x2fc   : > { %p1400_p10 = pnand %p1399_p11, %p2190_p0  ;;  %s1404_s13 = scalar_lea.vmem %s1403_s30, 1024 }
 0x2fd   : > { %s1067_s8 = sshll.u32 %s2188_s5, 8  ;;  %p1405_p5 = scmp.lt.s32.totalorder %s2052_s9, %s1403_s30 }
 0x2fe   : > { %s2049_s18 = scalar_lea.hbm %s2189_s17, %s1067_s8  ;;  %p1401_p1 = pneg %p1400_p10 }
 0x2ff   : > { %p1406_p12 = scmp.lt.s32.totalorder %s1404_s13, %s1398_s19 }
 0x301   : > { %p1407_p9 = por %p1406_p12, %p1405_p5 }
 0x303   : > { %p1408_p2 = pnand %p1407_p9, %p1401_p1 }
 0x305   : > { %1411 = shalt.err (!%p1408_p2)
}
 0x306   : > { %s1412_s4 = scalar_lea.hbm %s2049_s18, 512  ;;  %s1416_s28 = scalar_lea.hbm %s2189_s17, 1024 }
 0x307   : > { %p1413_p4 = scmp.ne.s32.totalorder %s2049_s18, %s1412_s4  ;;  %p1417_p6 = scmp.lt.s32.totalorder %s2049_s18, %s2189_s17 }
 0x308   : > { %p1418_p13 = scmp.lt.s32.totalorder %s1416_s28, %s1412_s4 }
 0x309   : > { %p1414_p3 = pnand %p1413_p4, %p2190_p0 }
 0x30a   : > { %p1419_p7 = por %p1418_p13, %p1417_p6 }
 0x30b   : > { %p1415_p8 = pneg %p1414_p3 }
 0x30d   : > { %p1420_p11 = pnand %p1419_p7, %p1415_p8 }
 0x30f   : > { %1423 = shalt.err (!%p1420_p11)
}
 0x310   : > { %s1567_s5 = smov 256   ;;  %s1568_s8 = smov 512  }
 0x311   : > { %s1569_s7 = smov 16  }
 0x312   : > { %1144 = dma.vmem_to_hbm [thread:$0]  (%p2190_p0), %s2052_s9, 512, %s2049_s18, %s844_s10, %s1567_s5, %s1568_s8, %s1569_s7  }
 0x313 PF: > { %s2191_s27 = sld [smem:[#allocation18_spill]]  ;;  %p1164_p10 = scmp.ge.s32.totalorder %s1554_s6, 2 }
 0x314   : > { %p2192_p1 = scmp.ne.s32.totalorder %s2178_s21, 0 }
 0x316   : > { %p1160_p5 = pnand %p1164_p10, %p2192_p1 }
 0x318   : > { %p1161_p12 = pneg %p1160_p5 }
 0x319   : > { %s875_s19 = sand.u32 1, %s2191_s27  }
 0x31a   : > { %s876_s14 = scalar_lea.sflag [#allocation6], %s875_s19 }
 0x31b   : > { %1497 = dma.done.wait (%p1161_p12), %s876_s14, 512  }
 0x31c   : > { %1499 = vsyncadd (%p1161_p12), %s876_s14, 4294966784  ;;  %s27_s6 = sadd.s32 1, %s1554_s6   ;;  %s2194_s18 = sld [smem:[#allocation19_spill]] }
 0x31d   : > { %p2082_p9 = scmp.ge.s32.totalorder %s27_s6, 6   ;;  %s2195_s28 = sld [smem:[#allocation22_spill]] }
 0x31e   : > { %s2196_s12 = sld [smem:[#allocation23_spill]]  ;;  %s2199_s19 = smov %s1510_s20 }
 0x31f   : > { %s2197_s3 = sld [smem:[#allocation24_spill]]  ;;  %s2200_s20 = smov %s1814_s0 }
 0x320   : > { %s2201_s21 = smov %s1518_s22  ;;  %s2202_s22 = smov %s1522_s23 }
 0x321   : > { %s2203_s23 = smov %s1704_s16  ;;  %s2204_s24 = smov %s1530_s25 }
 0x322   : > { %s2205_s25 = smov %s1534_s26  ;;  %s2206_s26 = smov %s1745_s15 }
 0x323   : > { %s2207_s27 = smov %s1546_s29  ;;  %26 = sbr.rel (!%p2082_p9) target bundleno = 21 (0x15), region = 133 }
 0x324   : > { %s2208_s29 = smov %s2196_s12 }
 0x325   : > { %s2209_s30 = smov %s2197_s3 }
 0x328   :  { %881 = vsyncpa [#allocation5], 1 }
 0x329   :  { %883 = vsyncpa [#allocation5 + $0x1], 1 }
 0x32a   :  { %884 = vsyncpa [#allocation8], 1 }
 0x32b   :  { %886 = vsyncpa [#allocation8 + $0x1], 1 }
 0x32c   :  { %887 = vsyncpa [#allocation11], 1 }
 0x32d   :  { %889 = vsyncpa [#allocation11 + $0x1], 1 }
 0x32e   :  { %890 = vsyncpa [#allocation6], 1 }
 0x32f   :  { %892 = vsyncpa [#allocation6 + $0x1], 1 }

</bundles_post_ra>
